<compile_context>
chip_gen: v7x
topology: tpu7x:2x2x1
jax: 0.10.0
libtpu: 0.0.40
codegen_flags: <defaults>
</compile_context>

<pallas_src>
import functools

import jax
import jax.numpy as jnp
from jax.experimental import pallas as pl
from jax.experimental.pallas import tpu as pltpu


def _distill_kl_kernel(ys_ref, yt_ref, rowkl_ref, *, inv_t):
    # (TB, C) logits -> (TB, 1) per-row (unscaled) KL divergence.
    ys = ys_ref[...].astype(jnp.float32) * inv_t
    yt = yt_ref[...].astype(jnp.float32) * inv_t

    # Student log-softmax along the class (lane) axis.
    ms = jnp.max(ys, axis=-1, keepdims=True)
    zs = ys - ms
    lse_s = jnp.log(jnp.sum(jnp.exp(zs), axis=-1, keepdims=True))
    log_ps = zs - lse_s

    # Teacher: shifted exponentials and their row sum.
    mt = jnp.max(yt, axis=-1, keepdims=True)
    zt = yt - mt
    et = jnp.exp(zt)
    st = jnp.sum(et, axis=-1, keepdims=True)
    log_st = jnp.log(st)

    # sum_c p_t (log p_t - log p_s) == (1/st) * sum_c e_t * (z_t - log st - log p_s)
    # Where e_t underflows to 0 the term is exactly 0 (all log terms are
    # finite), matching PyTorch kl_div's zero-target behavior.
    row_term = jnp.sum(et * (zt - log_st - log_ps), axis=-1, keepdims=True)
    rowkl_ref[...] = row_term * pl.reciprocal(st, approx=False)


def _pick_block_rows(batch, n_classes, itemsize):
    # Aim for ~512 KiB per input block: big enough to amortize the ~0.35us/step
    # overhead, small enough (x2 inputs x2 pipeline buffers) for the scoped
    # VMEM defaults on v5e (16 MiB), v6e (32 MiB) and v7x (32 MiB of 64 MiB).
    target_bytes = 512 * 1024
    tb = (target_bytes // max(1, n_classes * itemsize)) // 8 * 8
    tb = int(max(8, min(2048, tb)))
    if batch <= tb:
        return batch  # single block covering the full batch dim (always valid)
    return tb         # multiple of 8 (sublane-aligned)


def distill_kl(y_s, y_t, t=4, block_rows=None):
    """Pallas implementation of DistillKL.forward. Returns a scalar f32 loss."""
    assert y_s.shape == y_t.shape and y_s.ndim == 2
    batch, n_classes = y_s.shape

    itemsize = jnp.dtype(y_s.dtype).itemsize
    tb = _pick_block_rows(batch, n_classes, itemsize) if block_rows is None \
        else int(block_rows)
    if tb >= batch:
        tb = batch                     # block == full batch extent
    else:
        tb = max(8, (tb // 8) * 8)     # sublane-aligned tile
    num_blocks = pl.cdiv(batch, tb)
    padded_rows = num_blocks * tb      # output padded to a whole number of blocks

    kernel = functools.partial(_distill_kl_kernel, inv_t=1.0 / float(t))

    row_kl = pl.pallas_call(
        kernel,
        out_shape=jax.ShapeDtypeStruct((padded_rows, 1), jnp.float32),
        grid_spec=pltpu.PrefetchScalarGridSpec(
            num_scalar_prefetch=0,
            grid=(num_blocks,),
            in_specs=[
                pl.BlockSpec((tb, n_classes), lambda i: (i, 0)),
                pl.BlockSpec((tb, n_classes), lambda i: (i, 0)),
            ],
            out_specs=pl.BlockSpec((tb, 1), lambda i: (i, 0)),
        ),
        compiler_params=pltpu.CompilerParams(
            dimension_semantics=("parallel",)),
    )(y_s, y_t)

    # Rows >= batch in the padded last block are garbage; slice before reducing.
    # Final scale T^2 / batch matches the PyTorch module.
    return jnp.sum(row_kl[:batch, 0]) * (float(t) ** 2) / batch


def _reference(y_s, y_t, t=4):
    # Pure-JAX reference of the PyTorch module, for sanity checking.
    ls = jax.nn.log_softmax(y_s.astype(jnp.float32) / t, axis=1)
    pt = jax.nn.softmax(y_t.astype(jnp.float32) / t, axis=1)
    lt = jax.nn.log_softmax(y_t.astype(jnp.float32) / t, axis=1)
    kl = jnp.sum(jnp.where(pt > 0, pt * (lt - ls), 0.0))
    return kl * (t ** 2) / y_s.shape[0]


if __name__ == "__main__":
    key = jax.random.PRNGKey(0)
    k1, k2, k3, k4 = jax.random.split(key, 4)

    # Test 1: single-block path (B <= TB), f32 inputs.
    B, C = 8, 128
    y_s = jax.random.normal(k1, (B, C), dtype=jnp.float32) * 3.0
    y_t = jax.random.normal(k2, (B, C), dtype=jnp.float32) * 3.0
    loss = jax.block_until_ready(distill_kl(y_s, y_t, t=4))
    ref = _reference(y_s, y_t, t=4)
    assert jnp.allclose(loss, ref, rtol=1e-4, atol=1e-5), (loss, ref)

    # Test 2: multi-block path with a partial (padded) edge block, f32 inputs.
    B2, C2 = 20, 128
    y_s2 = jax.random.normal(k3, (B2, C2), dtype=jnp.float32) * 3.0
    y_t2 = jax.random.normal(k4, (B2, C2), dtype=jnp.float32) * 3.0
    loss2 = jax.block_until_ready(distill_kl(y_s2, y_t2, t=4, block_rows=8))
    ref2 = _reference(y_s2, y_t2, t=4)
    assert jnp.allclose(loss2, ref2, rtol=1e-4, atol=1e-5), (loss2, ref2)

    # Test 3: bf16 inputs (half the HBM traffic); compute is f32 inside.
    ys_bf16 = y_s.astype(jnp.bfloat16)
    yt_bf16 = y_t.astype(jnp.bfloat16)
    loss_bf16 = jax.block_until_ready(distill_kl(ys_bf16, yt_bf16, t=4))
    ref_bf16 = _reference(ys_bf16, yt_bf16, t=4)
    assert jnp.isfinite(loss_bf16)
    assert jnp.allclose(loss_bf16, ref_bf16, rtol=1e-4, atol=1e-5), (loss_bf16, ref_bf16)

    print("KERNEL_OK")
</pallas_src>

<mosaic_0001>
module attributes {stable_mosaic.version = 11 : i64} {
  func.func @_distill_kl_kernel(%arg0: i32, %arg1: memref<8x128xf32, #tpu.memory_space<vmem>>, %arg2: memref<8x128xf32, #tpu.memory_space<vmem>>, %arg3: memref<8x1xf32, #tpu.memory_space<vmem>>) attributes {dimension_semantics = [#tpu.dimension_semantics<parallel>], iteration_bounds = array<i64: 1>, scalar_prefetch = 0 : i64, scratch_operands = 0 : i64, tpu.core_type = #tpu.core_type<tc>, window_params = [{transform_indices = @transform_0, window_bounds = array<i64: 8, 128>}, {transform_indices = @transform_1, window_bounds = array<i64: 8, 128>}, {transform_indices = @transform_2, window_bounds = array<i64: 8, 1>}]} {
    %c0 = arith.constant 0 : index
    %c0_0 = arith.constant 0 : index
    %0 = vector.load %arg1[%c0, %c0_0] : memref<8x128xf32, #tpu.memory_space<vmem>>, vector<8x128xf32>
    %cst = arith.constant 2.500000e-01 : f32
    %1 = vector.broadcast %cst : f32 to vector<8x128xf32>
    %2 = arith.mulf %0, %1 : vector<8x128xf32>
    %c0_1 = arith.constant 0 : index
    %c0_2 = arith.constant 0 : index
    %3 = vector.load %arg2[%c0_1, %c0_2] : memref<8x128xf32, #tpu.memory_space<vmem>>, vector<8x128xf32>
    %cst_3 = arith.constant 2.500000e-01 : f32
    %4 = vector.broadcast %cst_3 : f32 to vector<8x128xf32>
    %5 = arith.mulf %3, %4 : vector<8x128xf32>
    %cst_4 = arith.constant dense<0xFF800000> : vector<8xf32>
    %6 = vector.multi_reduction <maximumf>, %2, %cst_4 [1] : vector<8x128xf32> to vector<8xf32>
    %7 = vector.shape_cast %6 : vector<8xf32> to vector<8x1xf32>
    %8 = vector.broadcast %7 : vector<8x1xf32> to vector<8x128xf32>
    %9 = arith.subf %2, %8 : vector<8x128xf32>
    %10 = math.exp %9 : vector<8x128xf32>
    %cst_5 = arith.constant dense<0.000000e+00> : vector<8xf32>
    %11 = vector.multi_reduction <add>, %10, %cst_5 [1] : vector<8x128xf32> to vector<8xf32>
    %12 = vector.shape_cast %11 : vector<8xf32> to vector<8x1xf32>
    %13 = math.log %12 : vector<8x1xf32>
    %14 = vector.broadcast %13 : vector<8x1xf32> to vector<8x128xf32>
    %15 = arith.subf %9, %14 : vector<8x128xf32>
    %cst_6 = arith.constant dense<0xFF800000> : vector<8xf32>
    %16 = vector.multi_reduction <maximumf>, %5, %cst_6 [1] : vector<8x128xf32> to vector<8xf32>
    %17 = vector.shape_cast %16 : vector<8xf32> to vector<8x1xf32>
    %18 = vector.broadcast %17 : vector<8x1xf32> to vector<8x128xf32>
    %19 = arith.subf %5, %18 : vector<8x128xf32>
    %20 = math.exp %19 : vector<8x128xf32>
    %cst_7 = arith.constant dense<0.000000e+00> : vector<8xf32>
    %21 = vector.multi_reduction <add>, %20, %cst_7 [1] : vector<8x128xf32> to vector<8xf32>
    %22 = vector.shape_cast %21 : vector<8xf32> to vector<8x1xf32>
    %23 = math.log %22 : vector<8x1xf32>
    %24 = vector.broadcast %23 : vector<8x1xf32> to vector<8x128xf32>
    %25 = arith.subf %19, %24 : vector<8x128xf32>
    %26 = arith.subf %25, %15 : vector<8x128xf32>
    %27 = arith.mulf %20, %26 : vector<8x128xf32>
    %cst_8 = arith.constant dense<0.000000e+00> : vector<8xf32>
    %28 = vector.multi_reduction <add>, %27, %cst_8 [1] : vector<8x128xf32> to vector<8xf32>
    %29 = vector.shape_cast %28 : vector<8xf32> to vector<8x1xf32>
    %30 = tpu.reciprocal %22 : vector<8x1xf32> -> vector<8x1xf32>
    %31 = arith.mulf %29, %30 : vector<8x1xf32>
    %c0_9 = arith.constant 0 : index
    %c0_10 = arith.constant 0 : index
    %32 = vector.load %arg3[%c0_9, %c0_10] : memref<8x1xf32, #tpu.memory_space<vmem>>, vector<8x1xf32>
    tpu.vector_store %arg3[%c0_9, %c0_10], %31 {strides = array<i32>} : memref<8x1xf32, #tpu.memory_space<vmem>>, vector<8x1xf32>,
    return
  }
  func.func @transform_0(%arg0: i32) -> (i32, i32) {
    %c0_i32 = arith.constant 0 : i32
    %c0_i32_0 = arith.constant 0 : i32
    return %arg0, %c0_i32 : i32, i32
  }
  func.func @transform_1(%arg0: i32) -> (i32, i32) {
    %c0_i32 = arith.constant 0 : i32
    %c0_i32_0 = arith.constant 0 : i32
    return %arg0, %c0_i32 : i32, i32
  }
  func.func @transform_2(%arg0: i32) -> (i32, i32) {
    %c0_i32 = arith.constant 0 : i32
    %c0_i32_0 = arith.constant 0 : i32
    return %arg0, %c0_i32 : i32, i32
  }
}

</mosaic_0001>

<bundles_post_ra>
// kernel: tpu_custom_call.1
= control target key start
LH: loop header
LB: loop body
LE: loop exit
PB: predicated region body
PF: predicated region fallthrough
CT: control target
= control target key end

     0   :  { %7 = vsyncpa [#allocation3], 0  ;;  %s177_s0 = inlined_call_operand.hbm [shape: f32[8,128], index: 0, kind: input, shape index: {}]   ;;  %s178_s1 = inlined_call_operand.hbm [shape: f32[8,128], index: 1, kind: input, shape index: {}]   ;;  %s179_s2 = inlined_call_operand.vmem [shape: f32[8,1], index: 2, kind: output, shape index: {}]  }
   0x1   :  { %8 = vsyncpa [#allocation5], 0  ;;  %s133_s9 = smov [#allocation2]   ;;  %s134_s11 = smov [#allocation4]  }
   0x2   :  { %s15_s10 = sshll.u32 %s133_s9, 4  ;;  %s25_s12 = sshll.u32 %s134_s11, 4  ;;  %s16_s10 = int_to_ptr.vmem [resolvable:$true] %s15_s10  ;;  %s26_s12 = int_to_ptr.vmem [resolvable:$true] %s25_s12 }
   0x3   :  { %s85_s15 = scalar_lea.hbm %s177_s0, 128 }
   0x4   :  { %p86_p0 = scmp.ne.s32.totalorder %s177_s0, %s85_s15  ;;  %p89_p1 = scmp.lt.u32.totalorder %s85_s15, %s177_s0 }
   0x6   :  { %p91_p2 = pnand %p89_p1, %p86_p0 }
   0x8   :  { %94 = shalt.err (!%p91_p2)
}
   0x9   :  { %s95_s20 = scalar_lea.vmem %s16_s10, 128  ;;  %p100_p4 = scmp.lt.s32.totalorder %s16_s10, %s16_s10 }
   0xa   :  { %p96_p3 = scmp.ne.s32.totalorder %s16_s10, %s95_s20  ;;  %p101_p5 = scmp.lt.s32.totalorder %s95_s20, %s95_s20 }
   0xc   :  { %p102_p6 = por %p101_p5, %p100_p4 }
   0xe   :  { %p103_p7 = pnand %p102_p6, %p96_p3 }
  0x10   :  { %106 = shalt.err (!%p103_p7)
}
  0x11   :  { %18 = dma.hbm_to_vmem [thread:$0]  %s177_s0, 128, %s16_s10, [#allocation3]  }
  0x12   :  { %s107_s25 = scalar_lea.hbm %s178_s1, 128 }
  0x13   :  { %p108_p8 = scmp.ne.s32.totalorder %s178_s1, %s107_s25  ;;  %p111_p9 = scmp.lt.u32.totalorder %s107_s25, %s178_s1 }
  0x15   :  { %p113_p10 = pnand %p111_p9, %p108_p8 }
  0x17   :  { %116 = shalt.err (!%p113_p10)
}
  0x18   :  { %s117_s30 = scalar_lea.vmem %s26_s12, 128  ;;  %p122_p12 = scmp.lt.s32.totalorder %s26_s12, %s26_s12 }
  0x19   :  { %p118_p11 = scmp.ne.s32.totalorder %s26_s12, %s117_s30  ;;  %p123_p13 = scmp.lt.s32.totalorder %s117_s30, %s117_s30 }
  0x1b   :  { %p124_p0 = por %p123_p13, %p122_p12 }
  0x1d   :  { %p125_p1 = pnand %p124_p0, %p118_p11 }
  0x1f   :  { %128 = shalt.err (!%p125_p1)
}
  0x20   :  { %28 = dma.hbm_to_vmem [thread:$0]  %s178_s1, 128, %s26_s12, [#allocation5]  }
  0x21   :  { %129 = dma.done.wait [#allocation3], 128  }
  0x22   :  { %130 = vsyncadd [#allocation3], 4294967168 }
  0x23   :  { %131 = dma.done.wait [#allocation5], 128  }
  0x24   :  { %132 = vsyncadd [#allocation5], 4294967168  ;;  %v35_v0 = vld [vmem:[#allocation2] sm:$0xff]  ;;  %v37_v1 = vld [vmem:[#allocation4] sm:$0xff]  ;;  %vm65_vm0 = vcmask 7168  }
  0x25   :  { %v36_v2 = vmul.f32 0.25, %v35_v0  ;;  %v38_v3 = vmul.f32 0.25, %v37_v1 }
  0x27   :  { %39 = vmax.xlane.f32.xlu0 %v36_v2 }
  0x2b   :  { %49 = vmax.xlane.f32.xlu0 %v38_v3 }
  0xb4   :  { %v40_v4 = vpop.xlane.xlu0 %39 }
  0xb5   :  { %v41_v5 = vsub.f32 %v36_v2, %v40_v4 }
  0xb7   :  { %v42_v6 = vmul.f32 1.442695, %v41_v5 }
  0xb8   :  { %v50_v7 = vpop.xlane.xlu0 %49 }
  0xb9   :  { %v51_v8 = vsub.f32 %v38_v3, %v50_v7  ;;  %75 = vpow2.f32 %v42_v6 }
  0xbb   :  { %v52_v9 = vmul.f32 1.442695, %v51_v8 }
  0xbd   :  { %77 = vpow2.f32 %v52_v9 }
  0xc3   :  { %v76_v10 = vpop.eup %75 }
  0xc4   :  { %44 = vadd.xlane.f32.xlu1 %v76_v10 }
  0xc7   :  { %v78_v11 = vpop.eup %77 }
  0xc8   :  { %54 = vadd.xlane.f32.xlu1 %v78_v11 }
 0x151   :  { %v45_v12 = vpop.xlane.xlu1 %44 }
 0x152   :  { %79 = vlog2.f32 %v45_v12 }
 0x155   :  { %v55_v13 = vpop.xlane.xlu1 %54 }
 0x156   :  { %81 = vlog2.f32 %v55_v13 }
 0x157   :  { %83 = vrcp.f32 %v55_v13 }
 0x15c   :  { %v80_v14 = vpop.eup %79 }
 0x15d   :  { %v47_v15 = vmul.f32 0.6931472, %v80_v14 }
 0x15f   :  { %v48_v18 = vsub.f32 %v41_v5, %v47_v15 }
 0x160   :  { %v82_v16 = vpop.eup %81 }
 0x161   :  { %v57_v17 = vmul.f32 0.6931472, %v82_v16  ;;  %v84_v22 = vpop.eup %83 }
 0x163   :  { %v58_v19 = vsub.f32 %v51_v8, %v57_v17 }
 0x165   :  { %v59_v20 = vsub.f32 %v58_v19, %v48_v18 }
 0x167   :  { %v60_v21 = vmul.f32 %v78_v11, %v59_v20 }
 0x169   :  { %61 = vadd.xlane.f32.xlu0 %v60_v21 }
 0x1f6   :  { %v62_v23 = vpop.xlane.xlu0 %61 }
 0x1f7   :  { %v64_v24 = vmul.f32 %v84_v22, %v62_v23 }
 0x1f9   :  { %66 = vst.msk [vmem:[%s179_s2] sm:$0xff] %vm65_vm0, %v64_v24 }
 0x1fa   :  { %71 = vsyncpa [#allocation3], 1 }
 0x1fb   :  { %72 = vsyncpa [#allocation5], 1 }

</bundles_post_ra>
